<compile_context>
chip_gen: v5e
topology: v5e:2x2
jax: 0.10.0
libtpu: 0.0.40
codegen_flags: <defaults>
</compile_context>

<pallas_src>
import jax
import jax.numpy as jnp
from jax.experimental import pallas as pl
from jax.experimental.pallas import tpu as pltpu


def rw_ae_kernel(x_ref, w1_ref, b1_ref, w2_ref, b2_ref, o_ref):
    # fc1 -> tanh   (f32 accumulate on the MXU, lane-dense 128-wide tiles)
    h = jnp.dot(x_ref[...], w1_ref[...], preferred_element_type=jnp.float32)
    h = jnp.tanh(h + b1_ref[...])                  # (1, De) broadcasts over rows

    # fc2 -> tanh
    y = jnp.dot(h.astype(w2_ref.dtype), w2_ref[...],
                preferred_element_type=jnp.float32)
    y = jnp.tanh(y + b2_ref[...])                  # (1, Dx) broadcasts over rows

    o_ref[...] = y.astype(o_ref.dtype)


def _round_up(n, m):
    return ((n + m - 1) // m) * m


def random_walk_ae_forward(x, w1, b1, w2, b2, *, block_batch=256):
    """x: (B, x_dim); w1: (x_dim, emb_dim); b1: (emb_dim,) or (1, emb_dim);
    w2: (emb_dim, x_dim); b2: (x_dim,) or (1, x_dim)."""
    B, x_dim = x.shape
    emb_dim = w1.shape[1]

    # Lane-dense feature dims (multiples of 128) and sublane-aligned batch tile.
    Dx = _round_up(x_dim, 128)
    De = _round_up(emb_dim, 128)
    TB = min(block_batch, _round_up(B, 8))
    Bp = _round_up(B, TB)

    dt = x.dtype
    xp = jnp.zeros((Bp, Dx), dt).at[:B, :x_dim].set(x)
    w1p = jnp.zeros((Dx, De), w1.dtype).at[:x_dim, :emb_dim].set(w1)
    w2p = jnp.zeros((De, Dx), w2.dtype).at[:emb_dim, :x_dim].set(w2)
    b1p = jnp.zeros((1, De), jnp.float32).at[:, :emb_dim].set(
        jnp.asarray(b1, jnp.float32).reshape(1, emb_dim))
    b2p = jnp.zeros((1, Dx), jnp.float32).at[:, :x_dim].set(
        jnp.asarray(b2, jnp.float32).reshape(1, x_dim))

    grid = (Bp // TB,)

    itemsize = jnp.dtype(dt).itemsize
    cost = pl.CostEstimate(
        flops=2 * Bp * Dx * De * 2,                 # two matmuls
        transcendentals=Bp * (De + Dx),             # two tanh layers
        bytes_accessed=(xp.size * itemsize
                        + w1p.size * jnp.dtype(w1.dtype).itemsize
                        + w2p.size * jnp.dtype(w2.dtype).itemsize
                        + (b1p.size + b2p.size) * 4
                        + Bp * Dx * itemsize),
    )

    out = pl.pallas_call(
        rw_ae_kernel,
        out_shape=jax.ShapeDtypeStruct((Bp, Dx), dt),
        grid=grid,
        in_specs=[
            pl.BlockSpec((TB, Dx), lambda i: (i, 0)),   # x tile per batch step
            pl.BlockSpec((Dx, De), lambda i: (0, 0)),   # w1 resident
            pl.BlockSpec((1, De), lambda i: (0, 0)),    # b1 resident (lane-dense)
            pl.BlockSpec((De, Dx), lambda i: (0, 0)),   # w2 resident
            pl.BlockSpec((1, Dx), lambda i: (0, 0)),    # b2 resident (lane-dense)
        ],
        out_specs=pl.BlockSpec((TB, Dx), lambda i: (i, 0)),
        compiler_params=pltpu.CompilerParams(
            dimension_semantics=("parallel",)),
        cost_estimate=cost,
    )(xp, w1p, b1p, w2p, b2p)

    return out[:B, :x_dim]


def init_params(key, x_dim, emb_dim, dtype=jnp.float32):
    """Deterministic init mimicking nn.Linear's uniform(-1/sqrt(fan_in), +)."""
    k1, k2, k3, k4 = jax.random.split(key, 4)
    lim1 = 1.0 / jnp.sqrt(x_dim)
    lim2 = 1.0 / jnp.sqrt(emb_dim)
    # stored as (in_dim, out_dim) for the kernel (transposed vs. PyTorch)
    w1 = jax.random.uniform(k1, (x_dim, emb_dim), dtype, -lim1, lim1)
    b1 = jax.random.uniform(k2, (1, emb_dim), dtype, -lim1, lim1)
    w2 = jax.random.uniform(k3, (emb_dim, x_dim), dtype, -lim2, lim2)
    b2 = jax.random.uniform(k4, (1, x_dim), dtype, -lim2, lim2)
    return w1, b1, w2, b2


def _ref_forward(x, w1, b1, w2, b2):
    return jnp.tanh(jnp.tanh(x @ w1 + b1) @ w2 + b2)


if __name__ == "__main__":
    key = jax.random.PRNGKey(0)
    k_x, k_p, k_x2 = jax.random.split(key, 3)

    # Small shapes consistent with the module.
    batch, x_dim, emb_dim = 8, 16, 32
    x = jax.random.normal(k_x, (batch, x_dim), jnp.float32)
    w1, b1, w2, b2 = init_params(k_p, x_dim, emb_dim)

    out = random_walk_ae_forward(x, w1, b1, w2, b2)
    out = jax.block_until_ready(out)
    ref = _ref_forward(x, w1, b1, w2, b2)
    assert out.shape == (batch, x_dim)
    assert jnp.allclose(out, ref, atol=1e-5, rtol=1e-5)

    # Also exercise the multi-step batch grid + padding path (grid=(3,)).
    x_big = jax.random.normal(k_x2, (384, x_dim), jnp.float32)
    out_big = jax.block_until_ready(
        random_walk_ae_forward(x_big, w1, b1, w2, b2, block_batch=128))
    ref_big = _ref_forward(x_big, w1, b1, w2, b2)
    assert out_big.shape == (384, x_dim)
    assert jnp.allclose(out_big, ref_big, atol=1e-5, rtol=1e-5)

    print("KERNEL_OK")
</pallas_src>

<mosaic_0001>
module attributes {stable_mosaic.version = 11 : i64} {
  func.func @rw_ae_kernel(%arg0: i32, %arg1: memref<8x128xf32, #tpu.memory_space<vmem>>, %arg2: memref<128x128xf32, #tpu.memory_space<vmem>>, %arg3: memref<1x128xf32, #tpu.memory_space<vmem>>, %arg4: memref<128x128xf32, #tpu.memory_space<vmem>>, %arg5: memref<1x128xf32, #tpu.memory_space<vmem>>, %arg6: memref<8x128xf32, #tpu.memory_space<vmem>>) attributes {dimension_semantics = [#tpu.dimension_semantics<parallel>], iteration_bounds = array<i64: 1>, scalar_prefetch = 0 : i64, scratch_operands = 0 : i64, tpu.core_type = #tpu.core_type<tc>, window_params = [{transform_indices = @transform_0, window_bounds = array<i64: 8, 128>}, {pipeline_mode = #tpu.pipeline_mode<synchronous>, transform_indices = @transform_1, window_bounds = array<i64: 128, 128>}, {pipeline_mode = #tpu.pipeline_mode<synchronous>, transform_indices = @transform_2, window_bounds = array<i64: 1, 128>}, {pipeline_mode = #tpu.pipeline_mode<synchronous>, transform_indices = @transform_3, window_bounds = array<i64: 128, 128>}, {pipeline_mode = #tpu.pipeline_mode<synchronous>, transform_indices = @transform_4, window_bounds = array<i64: 1, 128>}, {transform_indices = @transform_5, window_bounds = array<i64: 8, 128>}]} {
    %c0 = arith.constant 0 : index
    %c0_0 = arith.constant 0 : index
    %0 = vector.load %arg1[%c0, %c0_0] : memref<8x128xf32, #tpu.memory_space<vmem>>, vector<8x128xf32>
    %c0_1 = arith.constant 0 : index
    %c0_2 = arith.constant 0 : index
    %1 = vector.load %arg2[%c0_1, %c0_2] : memref<128x128xf32, #tpu.memory_space<vmem>>, vector<128x128xf32>
    %cst = arith.constant dense<0.000000e+00> : vector<8x128xf32>
    %2 = tpu.matmul %0, %1, %cst {dimension_numbers = #tpu.dot_dimension_numbers<[1], [0], [0], [1], [0, 0, 1, 1], [], []>} : vector<8x128xf32>, vector<128x128xf32>, vector<8x128xf32> -> vector<8x128xf32>
    %c0_3 = arith.constant 0 : index
    %c0_4 = arith.constant 0 : index
    %3 = vector.load %arg3[%c0_3, %c0_4] : memref<1x128xf32, #tpu.memory_space<vmem>>, vector<1x128xf32>
    %4 = vector.broadcast %3 : vector<1x128xf32> to vector<8x128xf32>
    %5 = arith.addf %2, %4 : vector<8x128xf32>
    %6 = math.tanh %5 : vector<8x128xf32>
    %c0_5 = arith.constant 0 : index
    %c0_6 = arith.constant 0 : index
    %7 = vector.load %arg4[%c0_5, %c0_6] : memref<128x128xf32, #tpu.memory_space<vmem>>, vector<128x128xf32>
    %cst_7 = arith.constant dense<0.000000e+00> : vector<8x128xf32>
    %8 = tpu.matmul %6, %7, %cst_7 {dimension_numbers = #tpu.dot_dimension_numbers<[1], [0], [0], [1], [0, 0, 1, 1], [], []>} : vector<8x128xf32>, vector<128x128xf32>, vector<8x128xf32> -> vector<8x128xf32>
    %c0_8 = arith.constant 0 : index
    %c0_9 = arith.constant 0 : index
    %9 = vector.load %arg5[%c0_8, %c0_9] : memref<1x128xf32, #tpu.memory_space<vmem>>, vector<1x128xf32>
    %10 = vector.broadcast %9 : vector<1x128xf32> to vector<8x128xf32>
    %11 = arith.addf %8, %10 : vector<8x128xf32>
    %12 = math.tanh %11 : vector<8x128xf32>
    %c0_10 = arith.constant 0 : index
    %c0_11 = arith.constant 0 : index
    %13 = vector.load %arg6[%c0_10, %c0_11] : memref<8x128xf32, #tpu.memory_space<vmem>>, vector<8x128xf32>
    tpu.vector_store %arg6[%c0_10, %c0_11], %12 {strides = array<i32>} : memref<8x128xf32, #tpu.memory_space<vmem>>, vector<8x128xf32>,
    return
  }
  func.func @transform_0(%arg0: i32) -> (i32, i32) {
    %c0_i32 = arith.constant 0 : i32
    %c0_i32_0 = arith.constant 0 : i32
    return %arg0, %c0_i32 : i32, i32
  }
  func.func @transform_1(%arg0: i32) -> (i32, i32) {
    %c0_i32 = arith.constant 0 : i32
    %c0_i32_0 = arith.constant 0 : i32
    %c0_i32_1 = arith.constant 0 : i32
    return %c0_i32, %c0_i32_0 : i32, i32
  }
  func.func @transform_2(%arg0: i32) -> (i32, i32) {
    %c0_i32 = arith.constant 0 : i32
    %c0_i32_0 = arith.constant 0 : i32
    %c0_i32_1 = arith.constant 0 : i32
    return %c0_i32, %c0_i32_0 : i32, i32
  }
  func.func @transform_3(%arg0: i32) -> (i32, i32) {
    %c0_i32 = arith.constant 0 : i32
    %c0_i32_0 = arith.constant 0 : i32
    %c0_i32_1 = arith.constant 0 : i32
    return %c0_i32, %c0_i32_0 : i32, i32
  }
  func.func @transform_4(%arg0: i32) -> (i32, i32) {
    %c0_i32 = arith.constant 0 : i32
    %c0_i32_0 = arith.constant 0 : i32
    %c0_i32_1 = arith.constant 0 : i32
    return %c0_i32, %c0_i32_0 : i32, i32
  }
  func.func @transform_5(%arg0: i32) -> (i32, i32) {
    %c0_i32 = arith.constant 0 : i32
    %c0_i32_0 = arith.constant 0 : i32
    return %arg0, %c0_i32 : i32, i32
  }
}

</mosaic_0001>

<bundles_post_ra>
// kernel: tpu_custom_call.1
= control target key start
LH: loop header
LB: loop body
LE: loop exit
PB: predicated region body
PF: predicated region fallthrough
CT: control target
= control target key end

     0   :  { %10 = vsyncpa [#allocation3], 0  ;;  %s336_s0 = inlined_call_operand.hbm [shape: f32[8,128], index: 0, kind: input, shape index: {}]   ;;  %s337_s1 = inlined_call_operand.hbm [shape: f32[128,128], index: 1, kind: input, shape index: {}]   ;;  %s338_s2 = inlined_call_operand.vmem [shape: f32[1,128], index: 2, kind: input, shape index: {}]   ;;  %s339_s3 = inlined_call_operand.hbm [shape: f32[128,128], index: 3, kind: input, shape index: {}]   ;;  %s340_s4 = inlined_call_operand.vmem [shape: f32[1,128], index: 4, kind: input, shape index: {}]   ;;  %s341_s5 = inlined_call_operand.hbm [shape: f32[8,128], index: 5, kind: output, shape index: {}]  }
   0x1   :  { %11 = vsyncpa [#allocation6], 0  ;;  %s28_s20 = sshll.u32 %s337_s1, 4  ;;  %s29_s20 = int_to_ptr.hbm [resolvable:$true] %s28_s20 }
   0x2   :  { %12 = vsyncpa [#allocation4], 0  ;;  %s282_s21 = smov [#allocation5]   ;;  %s18_s25 = sshll.u32 %s336_s0, 4  ;;  %s19_s25 = int_to_ptr.hbm [resolvable:$true] %s18_s25 }
   0x3   :  { %s30_s22 = sshll.u32 %s282_s21, 4  ;;  %s283_s26 = smov 128   ;;  %s31_s22 = int_to_ptr.vmem [resolvable:$true] %s30_s22 }
   0x4   :  { %s284_s27 = smov 8   ;;  %s285_s28 = smov [#allocation2]  }
   0x5   :  { %36 = dma.hbm_to_vmem [thread:$0]  %s29_s20, 2048, %s31_s22, [#allocation6], %s283_s26, %s283_s26, %s284_s27  }
   0x6   :  { %s20_s29 = sshll.u32 %s285_s28, 4  ;;  %s43_s7 = sshll.u32 %s339_s3, 4  ;;  %s21_s29 = int_to_ptr.vmem [resolvable:$true] %s20_s29  ;;  %s44_s7 = int_to_ptr.hbm [resolvable:$true] %s43_s7 }
   0x7   :  { %23 = dma.hbm_to_vmem [thread:$0]  %s19_s25, 128, %s21_s29, [#allocation3]  }
   0x8   :  { %s286_s1 = smov [#allocation7]  }
   0x9   :  { %s45_s8 = sshll.u32 %s286_s1, 4  ;;  %s46_s8 = int_to_ptr.vmem [resolvable:$true] %s45_s8 }
   0xa   :  { %51 = dma.hbm_to_vmem [thread:$0]  %s44_s7, 2048, %s46_s8, [#allocation6], %s283_s26, %s283_s26, %s284_s27  }
   0xb   :  { %276 = dma.done.wait [#allocation3], 128  }
   0xc   :  { %277 = vsyncadd [#allocation3], 4294967168 }
   0xd   :  { %278 = dma.done.wait [#allocation6], 4096  }
   0xe   :  { %279 = vsyncadd [#allocation6], 4294963200  ;;  %v82_v0 = vld [vmem:[#allocation5 + $0x78] sm:$0xff]  ;;  %v81_v1 = vld [vmem:[#allocation5 + $0x70] sm:$0xff]  ;;  %s287_s11 = smov [#allocation8]   ;;  %s157_s15 = sshll.u32 %s341_s5, 4  ;;  %s158_s15 = int_to_ptr.hbm [resolvable:$true] %s157_s15 }
   0xf   :  { %87 = vmatpush.msra.mxu0 %v82_v0  ;;  %v80_v2 = vld [vmem:[#allocation5 + $0x68] sm:$0xff]  ;;  %v79_v3 = vld [vmem:[#allocation5 + $0x60] sm:$0xff]  ;;  %v123_v4 = vld [vmem:[#allocation7 + $0x78] sm:$0xff]  ;;  %s155_s12 = sshll.u32 %s287_s11, 4  ;;  %s156_s12 = int_to_ptr.vmem [resolvable:$true] %s155_s12 }
  0x10   :  { %v78_v5 = vld [vmem:[#allocation5 + $0x58] sm:$0xff]  ;;  %128 = vmatpush.msra.mxu1 %v123_v4  ;;  %v122_v6 = vld [vmem:[#allocation7 + $0x70] sm:$0xff]  ;;  %v121_v7 = vld [vmem:[#allocation7 + $0x68] sm:$0xff] }
  0x11   :  { %88 = vmatpush.msra.mxu0 %v81_v1  ;;  %v77_v8 = vld [vmem:[#allocation5 + $0x50] sm:$0xff]  ;;  %v120_v9 = vld [vmem:[#allocation7 + $0x60] sm:$0xff]  ;;  %v76_v10 = vld [vmem:[#allocation5 + $0x48] sm:$0xff] }
  0x12   :  { %129 = vmatpush.msra.mxu1 %v122_v6  ;;  %v119_v11 = vld [vmem:[#allocation7 + $0x58] sm:$0xff]  ;;  %v75_v12 = vld [vmem:[#allocation5 + $0x40] sm:$0xff]  ;;  %v118_v13 = vld [vmem:[#allocation7 + $0x50] sm:$0xff] }
  0x13   :  { %89 = vmatpush.msra.mxu0 %v80_v2  ;;  %v74_v14 = vld [vmem:[#allocation5 + $0x38] sm:$0xff]  ;;  %v117_v15 = vld [vmem:[#allocation7 + $0x48] sm:$0xff]  ;;  %v73_v16 = vld [vmem:[#allocation5 + $0x30] sm:$0xff] }
  0x14   :  { %130 = vmatpush.msra.mxu1 %v121_v7  ;;  %v116_v17 = vld [vmem:[#allocation7 + $0x40] sm:$0xff]  ;;  %v72_v18 = vld [vmem:[#allocation5 + $0x28] sm:$0xff]  ;;  %v115_v19 = vld [vmem:[#allocation7 + $0x38] sm:$0xff] }
  0x15   :  { %90 = vmatpush.msra.mxu0 %v79_v3  ;;  %v71_v20 = vld [vmem:[#allocation5 + $0x20] sm:$0xff]  ;;  %v114_v21 = vld [vmem:[#allocation7 + $0x30] sm:$0xff]  ;;  %v70_v22 = vld [vmem:[#allocation5 + $0x18] sm:$0xff] }
  0x16   :  { %131 = vmatpush.msra.mxu1 %v120_v9  ;;  %v113_v23 = vld [vmem:[#allocation7 + $0x28] sm:$0xff]  ;;  %v69_v24 = vld [vmem:[#allocation5 + $0x10] sm:$0xff]  ;;  %v67_v26 = vld [vmem:[#allocation5] sm:$0xff] }
  0x17   :  { %91 = vmatpush.msra.mxu0 %v78_v5  ;;  %v68_v25 = vld [vmem:[#allocation5 + $0x8] sm:$0xff]  ;;  %v66_v27 = vld [vmem:[#allocation2] sm:$0xff]  ;;  %v112_v28 = vld [vmem:[#allocation7 + $0x20] sm:$0xff] }
  0x18   :  { %132 = vmatpush.msra.mxu1 %v119_v11  ;;  %v111_v29 = vld [vmem:[#allocation7 + $0x18] sm:$0xff]  ;;  %v110_v30 = vld [vmem:[#allocation7 + $0x10] sm:$0xff]  ;;  %v109_v31 = vld [vmem:[#allocation7 + $0x8] sm:$0xff] }
  0x19   :  { %92 = vmatpush.msra.mxu0 %v77_v8  ;;  %v108_v32 = vld [vmem:[#allocation7] sm:$0xff]  ;;  %v174_v33 = vld [vmem:[%s338_s2] ss:$0 sm:$0xff] }
  0x1a   :  { %133 = vmatpush.msra.mxu1 %v118_v13  ;;  %v175_v37 = vld [vmem:[%s340_s4] ss:$0 sm:$0xff] }
  0x1b   :  { %93 = vmatpush.msra.mxu0 %v76_v10 }
  0x1c   :  { %134 = vmatpush.msra.mxu1 %v117_v15 }
  0x1d   :  { %94 = vmatpush.msra.mxu0 %v75_v12 }
  0x1e   :  { %135 = vmatpush.msra.mxu1 %v116_v17 }
  0x1f   :  { %95 = vmatpush.msra.mxu0 %v74_v14 }
  0x20   :  { %136 = vmatpush.msra.mxu1 %v115_v19 }
  0x21   :  { %96 = vmatpush.msra.mxu0 %v73_v16 }
  0x22   :  { %137 = vmatpush.msra.mxu1 %v114_v21 }
  0x23   :  { %97 = vmatpush.msra.mxu0 %v72_v18 }
  0x24   :  { %138 = vmatpush.msra.mxu1 %v113_v23 }
  0x25   :  { %98 = vmatpush.msra.mxu0 %v71_v20 }
  0x26   :  { %139 = vmatpush.msra.mxu1 %v112_v28 }
  0x27   :  { %99 = vmatpush.msra.mxu0 %v70_v22 }
  0x28   :  { %140 = vmatpush.msra.mxu1 %v111_v29 }
  0x29   :  { %100 = vmatpush.msra.mxu0 %v69_v24 }
  0x2a   :  { %141 = vmatpush.msra.mxu1 %v110_v30 }
  0x2b   :  { %101 = vmatpush.msra.mxu0 %v68_v25 }
  0x2c   :  { %142 = vmatpush.msra.mxu1 %v109_v31 }
  0x2d   :  { %102 = vmatpush.msra.mxu0 %v67_v26 }
  0x2e   :  { %103 = vmatmul.f32.vlgmr.msra.gmra.mxu0 %v66_v27  ;;  %143 = vmatpush.msra.mxu1 %v108_v32 }
  0xab   :  { %v104_v34 = vpop.f32.mrf.mxu0 }
  0xac   :  { %v105_v35 = vadd.f32 %v174_v33, %v104_v34 }
  0xae   :  { %176 = vtanh.f32 %v105_v35 }
  0xb4   :  { %v177_v36 = vpop.eup %176 }
  0xb5   :  { %144 = vmatmul.f32.vlgmr.msra.gmra.mxu1 %v177_v36 }
 0x132   :  { %v145_v38 = vpop.f32.mrf.mxu1 }
 0x133   :  { %v146_v39 = vadd.f32 %v175_v37, %v145_v38 }
 0x135   :  { %178 = vtanh.f32 %v146_v39 }
 0x13b   :  { %v179_v40 = vpop.eup %178 }
 0x13c   :  { %149 = vst [vmem:[#allocation8] sm:$0xff] %v179_v40 }
 0x13d   :  { %160 = dma.vmem_to_hbm [thread:$0]  %s156_s12, 128, %s158_s15, [#allocation4]  }
 0x13e   :  { %280 = dma.done.wait [#allocation4], 128  }
 0x13f   :  { %281 = vsyncadd [#allocation4], 4294967168 }
 0x140   :  { %165 = vsyncpa [#allocation3], 1 }
 0x141   :  { %166 = vsyncpa [#allocation6], 1 }
 0x142   :  { %167 = vsyncpa [#allocation4], 1 }

</bundles_post_ra>
